<compile_context>
chip_gen: v7x
topology: tpu7x:2x2x1
jax: 0.10.0
libtpu: 0.0.40
codegen_flags: <defaults>
</compile_context>

<pallas_src>
import jax
import jax.numpy as jnp
import numpy as np
from jax.experimental import pallas as pl
from jax.experimental.pallas import tpu as pltpu


def _ciddg_kernel(x_ref, w1a_ref, b1a_ref, w2bd_ref, b2a_ref, w3bd_ref,
                  b3a_ref, o_ref):
    """All C discriminators applied to the shared feature in one invocation.

    x_ref:    (B, H)       f32  (cast to bf16 inside the kernel)
    w1a_ref:  (H, C*H)     bf16 class-major fused fc1
    w2bd_ref: (C*H, C*H)   bf16 block-diagonal fc2
    w3bd_ref: (C*H, C*NS)  bf16 block-diagonal fc3
    b*_ref:   f32 fused biases
    o_ref:    (C, B, NS)   f32 per-class log-softmax outputs
    """
    C, _, NS = o_ref.shape

    # Cast inside the kernel (avoids a separate wrapper-side convert op).
    x = x_ref[...].astype(jnp.bfloat16)                       # (B, H) bf16

    # fc1 fused across classes: one (B,H) x (H,C*H) MXU matmul, f32 accumulate.
    h1 = jnp.dot(x, w1a_ref[...], preferred_element_type=jnp.float32)
    h1 = jnp.maximum(h1 + b1a_ref[...], 0.0)                  # (B, C*H) f32

    # fc2 fused via block-diagonal packing: one (B,C*H) x (C*H,C*H) matmul.
    h1b = h1.astype(jnp.bfloat16)                              # single slab cast
    h2 = jnp.dot(h1b, w2bd_ref[...], preferred_element_type=jnp.float32)
    h2 = jnp.maximum(h2 + b2a_ref[...], 0.0)                  # (B, C*H) f32

    # fc3 fused via block-diagonal packing: one (B,C*H) x (C*H,C*NS) matmul.
    h2b = h2.astype(jnp.bfloat16)
    logits = jnp.dot(h2b, w3bd_ref[...],
                     preferred_element_type=jnp.float32) + b3a_ref[...]  # (B, C*NS)

    # Per-class numerically stable LogSoftmax along dim=1, f32; static stores.
    for c in range(C):                 # static unroll (C is small and known)
        lc = logits[:, c * NS:(c + 1) * NS]                   # (B, NS) f32
        m = jnp.max(lc, axis=1, keepdims=True)
        lse = jnp.log(jnp.sum(jnp.exp(lc - m), axis=1, keepdims=True)) + m
        o_ref[c] = lc - lse                                    # (B, NS) f32


def prepare_ciddg_params(params):
    """One-time conversion of stacked f32 per-class params ([C, in, out] weights,
    [C, 1, out] biases) into the fused kernel layout:
      * fc1 weights packed class-major as (H, C*H),
      * fc2 / fc3 weights packed block-diagonally as (C*H, C*H) / (C*H, C*NS),
      * matmul weights stored in bf16, biases fused class-major in f32.
    The off-diagonal blocks are exact zeros, so they never corrupt other
    classes.  Run once outside the forward pass."""
    w1, b1, w2, b2, w3, b3 = params
    C, H, _ = w1.shape
    NS = w3.shape[-1]

    # fc1: [C, H, H] -> [H, C*H] class-major.
    w1_all = jnp.transpose(w1, (1, 0, 2)).reshape(H, C * H).astype(jnp.bfloat16)
    b1_all = jnp.transpose(b1, (1, 0, 2)).reshape(1, C * H)           # f32

    # fc2 / fc3: block-diagonal, class-major on both axes.
    w2_bd = jnp.zeros((C * H, C * H), jnp.float32)
    w3_bd = jnp.zeros((C * H, C * NS), jnp.float32)
    for c in range(C):
        w2_bd = w2_bd.at[c * H:(c + 1) * H, c * H:(c + 1) * H].set(w2[c])
        w3_bd = w3_bd.at[c * H:(c + 1) * H, c * NS:(c + 1) * NS].set(w3[c])
    b2_all = jnp.transpose(b2, (1, 0, 2)).reshape(1, C * H)           # f32
    b3_all = jnp.transpose(b3, (1, 0, 2)).reshape(1, C * NS)          # f32

    return (w1_all, b1_all,
            w2_bd.astype(jnp.bfloat16), b2_all,
            w3_bd.astype(jnp.bfloat16), b3_all)


@jax.jit
def ciddg_forward(feature, kernel_params):
    """feature: [B, H] f32.  Returns a stacked [C, B, NS] f32 array; out[c] is
    the log-softmax output of the c-th discriminator (PyTorch returns a list)."""
    w1a, b1a, w2bd, b2a, w3bd, b3a = kernel_params
    B = feature.shape[0]
    H = w1a.shape[0]
    C = w1a.shape[1] // H
    NS = w3bd.shape[1] // C

    vmem = pl.BlockSpec(memory_space=pltpu.MemorySpace.VMEM)
    out = pl.pallas_call(
        _ciddg_kernel,
        out_shape=jax.ShapeDtypeStruct((C, B, NS), jnp.float32),
        in_specs=[vmem] * 7,
        out_specs=vmem,
    )(feature, w1a, b1a, w2bd, b2a, w3bd, b3a)
    return out


def _init_linear(key, fan_in, fan_out):
    """Deterministic init matching PyTorch nn.Linear's uniform(-1/sqrt(in), 1/sqrt(in)).
    Returned weight is [in, out] (transposed vs torch's [out, in])."""
    kw, kb = jax.random.split(key)
    bound = 1.0 / np.sqrt(fan_in)
    w = jax.random.uniform(kw, (fan_in, fan_out), jnp.float32, -bound, bound)
    b = jax.random.uniform(kb, (1, fan_out), jnp.float32, -bound, bound)
    return w, b


def make_ciddg_params(key, hidden, num_source, num_classes):
    """CIDDG.__init__ deep-copies the SAME Discriminator num_classes times, so
    all per-class discriminators share identical initial weights; mirrored here
    by tiling one deterministic init along the class axis."""
    k1, k2, k3 = jax.random.split(key, 3)
    w1, b1 = _init_linear(k1, hidden, hidden)
    w2, b2 = _init_linear(k2, hidden, hidden)
    w3, b3 = _init_linear(k3, hidden, num_source)
    tile = lambda a: jnp.tile(a[None], (num_classes,) + (1,) * a.ndim)
    return (tile(w1), tile(b1), tile(w2), tile(b2), tile(w3), tile(b3))


def _reference_forward(feature, params):
    """Pure-JAX per-class reference of the same math (bf16 operands / f32 acc)."""
    w1, b1, w2, b2, w3, b3 = params
    x = feature.astype(jnp.bfloat16)
    outs = []
    for c in range(w1.shape[0]):
        h = jnp.dot(x, w1[c].astype(jnp.bfloat16),
                    preferred_element_type=jnp.float32) + b1[c]
        h = jnp.maximum(h, 0.0)
        h = jnp.dot(h.astype(jnp.bfloat16), w2[c].astype(jnp.bfloat16),
                    preferred_element_type=jnp.float32) + b2[c]
        h = jnp.maximum(h, 0.0)
        logits = jnp.dot(h.astype(jnp.bfloat16), w3[c].astype(jnp.bfloat16),
                         preferred_element_type=jnp.float32) + b3[c]
        outs.append(jax.nn.log_softmax(logits, axis=1))
    return outs


if __name__ == "__main__":
    # Small shapes consistent with the module (Discriminator uses hidden_layer
    # and num_source; CIDDG uses num_classes discriminators).
    B, H, NS, C = 8, 128, 6, 3      # batch, hidden_layer, num_source, num_classes

    key = jax.random.PRNGKey(0)
    kf, kp = jax.random.split(key)
    feature = jax.random.normal(kf, (B, H), jnp.float32)
    params = make_ciddg_params(kp, H, NS, C)
    kernel_params = prepare_ciddg_params(params)

    out = jax.block_until_ready(ciddg_forward(feature, kernel_params))  # (C,B,NS)

    # Correctness check against a pure-JAX reference of the same math.
    refs = _reference_forward(feature, params)
    for c in range(C):
        np.testing.assert_allclose(np.asarray(out[c]), np.asarray(refs[c]),
                                   rtol=1e-3, atol=1e-3)

    # TODO(synk): ReverseLayerF / GradMultiplyLayerF only alter gradients; a
    # custom_vjp would be needed to reproduce the backward scaling.
    print("KERNEL_OK")
</pallas_src>

<mosaic_0001>
module attributes {stable_mosaic.version = 11 : i64} {
  func.func @_ciddg_kernel(%arg0: memref<8x128xf32, #tpu.memory_space<vmem>>, %arg1: memref<128x384xbf16, #tpu.memory_space<vmem>>, %arg2: memref<1x384xf32, #tpu.memory_space<vmem>>, %arg3: memref<384x384xbf16, #tpu.memory_space<vmem>>, %arg4: memref<1x384xf32, #tpu.memory_space<vmem>>, %arg5: memref<384x18xbf16, #tpu.memory_space<vmem>>, %arg6: memref<1x18xf32, #tpu.memory_space<vmem>>, %arg7: memref<3x8x6xf32, #tpu.memory_space<vmem>>) attributes {dimension_semantics = [], scalar_prefetch = 0 : i64, scratch_operands = 0 : i64, tpu.core_type = #tpu.core_type<tc>} {
    %c0 = arith.constant 0 : index
    %c0_0 = arith.constant 0 : index
    %0 = vector.load %arg0[%c0, %c0_0] : memref<8x128xf32, #tpu.memory_space<vmem>>, vector<8x128xf32>
    %1 = arith.truncf %0 : vector<8x128xf32> to vector<8x128xbf16>
    %c0_1 = arith.constant 0 : index
    %c0_2 = arith.constant 0 : index
    %2 = vector.load %arg1[%c0_1, %c0_2] : memref<128x384xbf16, #tpu.memory_space<vmem>>, vector<128x384xbf16>
    %cst = arith.constant dense<0.000000e+00> : vector<8x384xf32>
    %3 = tpu.matmul %1, %2, %cst {dimension_numbers = #tpu.dot_dimension_numbers<[1], [0], [0], [1], [0, 0, 1, 1], [], []>} : vector<8x128xbf16>, vector<128x384xbf16>, vector<8x384xf32> -> vector<8x384xf32>
    %c0_3 = arith.constant 0 : index
    %c0_4 = arith.constant 0 : index
    %4 = vector.load %arg2[%c0_3, %c0_4] : memref<1x384xf32, #tpu.memory_space<vmem>>, vector<1x384xf32>
    %5 = vector.broadcast %4 : vector<1x384xf32> to vector<8x384xf32>
    %6 = arith.addf %3, %5 : vector<8x384xf32>
    %cst_5 = arith.constant 0.000000e+00 : f32
    %7 = vector.broadcast %cst_5 : f32 to vector<8x384xf32>
    %8 = arith.maximumf %6, %7 : vector<8x384xf32>
    %9 = arith.truncf %8 : vector<8x384xf32> to vector<8x384xbf16>
    %c0_6 = arith.constant 0 : index
    %c0_7 = arith.constant 0 : index
    %10 = vector.load %arg3[%c0_6, %c0_7] : memref<384x384xbf16, #tpu.memory_space<vmem>>, vector<384x384xbf16>
    %cst_8 = arith.constant dense<0.000000e+00> : vector<8x384xf32>
    %11 = tpu.matmul %9, %10, %cst_8 {dimension_numbers = #tpu.dot_dimension_numbers<[1], [0], [0], [1], [0, 0, 1, 1], [], []>} : vector<8x384xbf16>, vector<384x384xbf16>, vector<8x384xf32> -> vector<8x384xf32>
    %c0_9 = arith.constant 0 : index
    %c0_10 = arith.constant 0 : index
    %12 = vector.load %arg4[%c0_9, %c0_10] : memref<1x384xf32, #tpu.memory_space<vmem>>, vector<1x384xf32>
    %13 = vector.broadcast %12 : vector<1x384xf32> to vector<8x384xf32>
    %14 = arith.addf %11, %13 : vector<8x384xf32>
    %cst_11 = arith.constant 0.000000e+00 : f32
    %15 = vector.broadcast %cst_11 : f32 to vector<8x384xf32>
    %16 = arith.maximumf %14, %15 : vector<8x384xf32>
    %17 = arith.truncf %16 : vector<8x384xf32> to vector<8x384xbf16>
    %c0_12 = arith.constant 0 : index
    %c0_13 = arith.constant 0 : index
    %18 = vector.load %arg5[%c0_12, %c0_13] : memref<384x18xbf16, #tpu.memory_space<vmem>>, vector<384x18xbf16>
    %cst_14 = arith.constant dense<0.000000e+00> : vector<8x18xf32>
    %19 = tpu.matmul %17, %18, %cst_14 {dimension_numbers = #tpu.dot_dimension_numbers<[1], [0], [0], [1], [0, 0, 1, 1], [], []>} : vector<8x384xbf16>, vector<384x18xbf16>, vector<8x18xf32> -> vector<8x18xf32>
    %c0_15 = arith.constant 0 : index
    %c0_16 = arith.constant 0 : index
    %20 = vector.load %arg6[%c0_15, %c0_16] : memref<1x18xf32, #tpu.memory_space<vmem>>, vector<1x18xf32>
    %21 = vector.broadcast %20 : vector<1x18xf32> to vector<8x18xf32>
    %22 = arith.addf %19, %21 : vector<8x18xf32>
    %23 = vector.extract_strided_slice %22 {offsets = [0, 0], sizes = [8, 6], strides = [1, 1]} : vector<8x18xf32> to vector<8x6xf32>
    %cst_17 = arith.constant dense<0xFF800000> : vector<8xf32>
    %24 = vector.multi_reduction <maximumf>, %23, %cst_17 [1] : vector<8x6xf32> to vector<8xf32>
    %25 = vector.shape_cast %24 : vector<8xf32> to vector<8x1xf32>
    %26 = vector.broadcast %25 : vector<8x1xf32> to vector<8x6xf32>
    %27 = arith.subf %23, %26 : vector<8x6xf32>
    %28 = math.exp %27 : vector<8x6xf32>
    %cst_18 = arith.constant dense<0.000000e+00> : vector<8xf32>
    %29 = vector.multi_reduction <add>, %28, %cst_18 [1] : vector<8x6xf32> to vector<8xf32>
    %30 = vector.shape_cast %29 : vector<8xf32> to vector<8x1xf32>
    %31 = math.log %30 : vector<8x1xf32>
    %32 = arith.addf %31, %25 : vector<8x1xf32>
    %33 = vector.broadcast %32 : vector<8x1xf32> to vector<8x6xf32>
    %34 = arith.subf %23, %33 : vector<8x6xf32>
    %c0_19 = arith.constant 0 : index
    %c0_20 = arith.constant 0 : index
    %c0_21 = arith.constant 0 : index
    %35 = vector.load %arg7[%c0_19, %c0_20, %c0_21] : memref<3x8x6xf32, #tpu.memory_space<vmem>>, vector<1x8x6xf32>
    %36 = vector.shape_cast %35 : vector<1x8x6xf32> to vector<8x6xf32>
    %37 = vector.shape_cast %34 : vector<8x6xf32> to vector<1x8x6xf32>
    tpu.vector_store %arg7[%c0_19, %c0_20, %c0_21], %37 {strides = array<i32>} : memref<3x8x6xf32, #tpu.memory_space<vmem>>, vector<1x8x6xf32>,
    %38 = vector.extract_strided_slice %22 {offsets = [0, 6], sizes = [8, 6], strides = [1, 1]} : vector<8x18xf32> to vector<8x6xf32>
    %cst_22 = arith.constant dense<0xFF800000> : vector<8xf32>
    %39 = vector.multi_reduction <maximumf>, %38, %cst_22 [1] : vector<8x6xf32> to vector<8xf32>
    %40 = vector.shape_cast %39 : vector<8xf32> to vector<8x1xf32>
    %41 = vector.broadcast %40 : vector<8x1xf32> to vector<8x6xf32>
    %42 = arith.subf %38, %41 : vector<8x6xf32>
    %43 = math.exp %42 : vector<8x6xf32>
    %cst_23 = arith.constant dense<0.000000e+00> : vector<8xf32>
    %44 = vector.multi_reduction <add>, %43, %cst_23 [1] : vector<8x6xf32> to vector<8xf32>
    %45 = vector.shape_cast %44 : vector<8xf32> to vector<8x1xf32>
    %46 = math.log %45 : vector<8x1xf32>
    %47 = arith.addf %46, %40 : vector<8x1xf32>
    %48 = vector.broadcast %47 : vector<8x1xf32> to vector<8x6xf32>
    %49 = arith.subf %38, %48 : vector<8x6xf32>
    %c1 = arith.constant 1 : index
    %c0_24 = arith.constant 0 : index
    %c0_25 = arith.constant 0 : index
    %50 = vector.load %arg7[%c1, %c0_24, %c0_25] : memref<3x8x6xf32, #tpu.memory_space<vmem>>, vector<1x8x6xf32>
    %51 = vector.shape_cast %50 : vector<1x8x6xf32> to vector<8x6xf32>
    %52 = vector.shape_cast %49 : vector<8x6xf32> to vector<1x8x6xf32>
    tpu.vector_store %arg7[%c1, %c0_24, %c0_25], %52 {strides = array<i32>} : memref<3x8x6xf32, #tpu.memory_space<vmem>>, vector<1x8x6xf32>,
    %53 = vector.extract_strided_slice %22 {offsets = [0, 12], sizes = [8, 6], strides = [1, 1]} : vector<8x18xf32> to vector<8x6xf32>
    %cst_26 = arith.constant dense<0xFF800000> : vector<8xf32>
    %54 = vector.multi_reduction <maximumf>, %53, %cst_26 [1] : vector<8x6xf32> to vector<8xf32>
    %55 = vector.shape_cast %54 : vector<8xf32> to vector<8x1xf32>
    %56 = vector.broadcast %55 : vector<8x1xf32> to vector<8x6xf32>
    %57 = arith.subf %53, %56 : vector<8x6xf32>
    %58 = math.exp %57 : vector<8x6xf32>
    %cst_27 = arith.constant dense<0.000000e+00> : vector<8xf32>
    %59 = vector.multi_reduction <add>, %58, %cst_27 [1] : vector<8x6xf32> to vector<8xf32>
    %60 = vector.shape_cast %59 : vector<8xf32> to vector<8x1xf32>
    %61 = math.log %60 : vector<8x1xf32>
    %62 = arith.addf %61, %55 : vector<8x1xf32>
    %63 = vector.broadcast %62 : vector<8x1xf32> to vector<8x6xf32>
    %64 = arith.subf %53, %63 : vector<8x6xf32>
    %c2 = arith.constant 2 : index
    %c0_28 = arith.constant 0 : index
    %c0_29 = arith.constant 0 : index
    %65 = vector.load %arg7[%c2, %c0_28, %c0_29] : memref<3x8x6xf32, #tpu.memory_space<vmem>>, vector<1x8x6xf32>
    %66 = vector.shape_cast %65 : vector<1x8x6xf32> to vector<8x6xf32>
    %67 = vector.shape_cast %64 : vector<8x6xf32> to vector<1x8x6xf32>
    tpu.vector_store %arg7[%c2, %c0_28, %c0_29], %67 {strides = array<i32>} : memref<3x8x6xf32, #tpu.memory_space<vmem>>, vector<1x8x6xf32>,
    return
  }
}

</mosaic_0001>

<bundles_post_ra>
// kernel: ciddg_forward.1
= control target key start
LH: loop header
LB: loop body
LE: loop exit
PB: predicated region body
PF: predicated region fallthrough
CT: control target
= control target key end

     0   :  { %12 = vsyncpa [#allocation3], 0  ;;  %s2104_s0 = inlined_call_operand.vmem [shape: f32[8,128], index: 0, kind: input, shape index: {}]   ;;  %s2105_s1 = inlined_call_operand.vmem [shape: bf16[128,384], index: 1, kind: input, shape index: {}]   ;;  %s2106_s2 = inlined_call_operand.vmem [shape: f32[1,384], index: 2, kind: input, shape index: {}]   ;;  %s2107_s3 = inlined_call_operand.hbm [shape: bf16[384,384], index: 3, kind: input, shape index: {}]   ;;  %s2108_s4 = inlined_call_operand.vmem [shape: f32[1,384], index: 4, kind: input, shape index: {}]   ;;  %s2109_s5 = inlined_call_operand.vmem [shape: bf16[384,18], index: 5, kind: input, shape index: {}]   ;;  %s2110_s6 = inlined_call_operand.vmem [shape: f32[1,18], index: 6, kind: input, shape index: {}]   ;;  %s2111_s7 = inlined_call_operand.hbm [shape: f32[3,8,6], index: 7, kind: output, shape index: {}]  }
   0x1   :  { %13 = vsyncpa [#allocation4], 0  ;;  %s1813_s24 = smov [#allocation2]   ;;  %s1765_s28 = scalar_lea.hbm %s2107_s3, 9216 }
   0x2   :  { %s25_s25 = sshll.u32 %s1813_s24, 4  ;;  %p1766_p0 = scmp.ne.s32.totalorder %s2107_s3, %s1765_s28  ;;  %s26_s25 = int_to_ptr.vmem [resolvable:$true] %s25_s25 }
   0x3   :  { %p1769_p1 = scmp.lt.u32.totalorder %s1765_s28, %s2107_s3 }
   0x5   :  { %p1771_p2 = pnand %p1769_p1, %p1766_p0 }
   0x7   :  { %1774 = shalt.err (!%p1771_p2)
}
   0x8   :  { %s1775_s10 = scalar_lea.vmem %s26_s25, 9216  ;;  %p1780_p4 = scmp.lt.s32.totalorder %s26_s25, %s26_s25 }
   0x9   :  { %p1776_p3 = scmp.ne.s32.totalorder %s26_s25, %s1775_s10  ;;  %p1781_p5 = scmp.lt.s32.totalorder %s1775_s10, %s1775_s10 }
   0xb   :  { %p1782_p6 = por %p1781_p5, %p1780_p4 }
   0xd   :  { %p1783_p7 = pnand %p1782_p6, %p1776_p3 }
   0xf   :  { %1786 = shalt.err (!%p1783_p7)
}
  0x10   :  { %s1814_s11 = smov 192   ;;  %s1815_s12 = smov 12  }
  0x11   :  { %31 = dma.hbm_to_vmem [thread:$0]  %s2107_s3, 9216, %s26_s25, [#allocation3], %s1814_s11, %s1814_s11, %s1815_s12  }
  0x12   :  { %1809 = dma.done.wait [#allocation3], 9216  }
  0x13   :  { %1810 = vsyncadd [#allocation3], 4294958080  ;;  %v1816_v0 = vmov 0.0   ;;  %v1817_v1 = vmov 0   ;;  %vm1818_vm0 = vmmov 0   ;;  %v42_v23 = vld [vmem:[%s2104_s0] sm:$0xff] }
  0x14   :  { %1524 = vmatprep.subr.bf16.mxu1 %v1816_v0  ;;  %253 = vmatprep.mubr.bf16.mxu0 %v1817_v1  ;;  %v1601_v2 = vld [vmem:[%s2105_s1 + $0x4] ss:$12 sps:$4 sm:$0xff]   ;;  %v1603_v3 = vld [vmem:[%s2105_s1] ss:$12 sps:$4 sm:$0xff]   ;;  %v1604_v4 = vld [vmem:[%s2105_s1 + $0x1c] ss:$12 sps:$4 sm:$0xff]   ;;  %v43_v26 = vpack.c.bf16 %v42_v23, %v42_v23 }
  0x15   :  { %1540 = vmatprep.mubr.msk.bf16.mxu1 %vm1818_vm0, %v1816_v0  ;;  %221 = vmatprep.subr.bf16.mxu0 %v1601_v2  ;;  %v1606_v5 = vld [vmem:[%s2105_s1 + $0x18] ss:$12 sps:$4 sm:$0xff]   ;;  %v1607_v6 = vld [vmem:[%s2105_s1 + $0x34] ss:$12 sps:$4 sm:$0xff]   ;;  %v1609_v7 = vld [vmem:[%s2105_s1 + $0x30] ss:$12 sps:$4 sm:$0xff]  }
  0x16   :  { %222 = vmatpush1.bf16.msra.mxu0 %v1603_v3  ;;  %v1610_v8 = vld [vmem:[%s2105_s1 + $0x4c] ss:$12 sps:$4 sm:$0xff]   ;;  %v1612_v9 = vld [vmem:[%s2105_s1 + $0x48] ss:$12 sps:$4 sm:$0xff]   ;;  %v1613_v11 = vld [vmem:[%s2105_s1 + $0x64] ss:$12 sps:$4 sm:$0xff]  }
  0x17   :  { %223 = vmatprep.subr.bf16.mxu0 %v1604_v4  ;;  %v1625_v10 = vld [vmem:[%s2105_s1 + $0x8] ss:$12 sps:$4 sm:$0xff]   ;;  %v1626_v12 = vld [vmem:[%s2105_s1 + $0x20] ss:$12 sps:$4 sm:$0xff]   ;;  %v1627_v15 = vld [vmem:[%s2105_s1 + $0x38] ss:$12 sps:$4 sm:$0xff]  }
  0x18   :  { %1525 = vmatpush3.bf16.msra.mxu1 %v1625_v10  ;;  %v1615_v13 = vld [vmem:[%s2105_s1 + $0x60] ss:$12 sps:$4 sm:$0xff]   ;;  %v1616_v14 = vld [vmem:[%s2105_s1 + $0x7c] ss:$12 sps:$4 sm:$0xff]   ;;  %v1618_v16 = vld [vmem:[%s2105_s1 + $0x78] ss:$12 sps:$4 sm:$0xff]  }
  0x19   :  { %1526 = vmatprep.subr.bf16.mxu1 %v1816_v0  ;;  %v1619_v17 = vld [vmem:[%s2105_s1 + $0x94] ss:$12 sps:$4 sm:$0xff]   ;;  %v1628_v18 = vld [vmem:[%s2105_s1 + $0x50] ss:$12 sps:$4 sm:$0xff]   ;;  %v1622_v20 = vld [vmem:[%s2105_s1 + $0xac] ss:$12 sps:$4 sm:$0xff]  }
  0x1a   :  { %224 = vmatpush1.bf16.msra.mxu0 %v1606_v5  ;;  %v1621_v19 = vld [vmem:[%s2105_s1 + $0x90] ss:$12 sps:$4 sm:$0xff]   ;;  %v1629_v21 = vld [vmem:[%s2105_s1 + $0x68] ss:$12 sps:$4 sm:$0xff]   ;;  %v1630_v25 = vld [vmem:[%s2105_s1 + $0x80] ss:$12 sps:$4 sm:$0xff]  }
  0x1b   :  { %225 = vmatprep.subr.bf16.mxu0 %v1607_v6  ;;  %v1624_v22 = vld [vmem:[%s2105_s1 + $0xa8] ss:$12 sps:$4 sm:$0xff]   ;;  %v1635_v24 = vld [vmem:[#allocation2 + $0x4] ss:$12 sps:$4 sm:$0xff]   ;;  %v1633_v27 = vld [vmem:[#allocation2] ss:$12 sps:$4 sm:$0xff]  }
  0x1c   :  { %1527 = vmatpush3.bf16.msra.mxu1 %v1626_v12  ;;  %v1638_v28 = vld [vmem:[#allocation2 + $0x1c] ss:$12 sps:$4 sm:$0xff]   ;;  %v1631_v29 = vld [vmem:[%s2105_s1 + $0x98] ss:$12 sps:$4 sm:$0xff]   ;;  %v1641_v31 = vld [vmem:[#allocation2 + $0x34] ss:$12 sps:$4 sm:$0xff]  }
  0x1d   :  { %1528 = vmatprep.subr.bf16.mxu1 %v1816_v0  ;;  %v1636_v30 = vld [vmem:[#allocation2 + $0x18] ss:$12 sps:$4 sm:$0xff]   ;;  %v1632_v32 = vld [vmem:[%s2105_s1 + $0xb0] ss:$12 sps:$4 sm:$0xff]   ;;  %v1660_v33 = vld [vmem:[#allocation2 + $0xc8] ss:$12 sps:$4 sm:$0xff]  }
  0x1e   :  { %226 = vmatpush1.bf16.msra.mxu0 %v1609_v7  ;;  %v1639_v34 = vld [vmem:[#allocation2 + $0x30] ss:$12 sps:$4 sm:$0xff]   ;;  %v1644_v35 = vld [vmem:[#allocation2 + $0x4c] ss:$12 sps:$4 sm:$0xff]   ;;  %v1661_v36 = vld [vmem:[#allocation2 + $0x8] ss:$12 sps:$4 sm:$0xff]  }
  0x1f   :  { %227 = vmatprep.subr.bf16.mxu0 %v1610_v8  ;;  %v1665_v37 = vld [vmem:[#allocation2 + $0xe0] ss:$12 sps:$4 sm:$0xff]   ;;  %v1642_v38 = vld [vmem:[#allocation2 + $0x48] ss:$12 sps:$4 sm:$0xff]   ;;  %v1647_v39 = vld [vmem:[#allocation2 + $0x64] ss:$12 sps:$4 sm:$0xff]  }
  0x20   :  { %1529 = vmatpush3.bf16.msra.mxu1 %v1627_v15  ;;  %v1666_v40 = vld [vmem:[#allocation2 + $0x20] ss:$12 sps:$4 sm:$0xff]   ;;  %v1670_v41 = vld [vmem:[#allocation2 + $0xf8] ss:$12 sps:$4 sm:$0xff]   ;;  %v1650_v43 = vld [vmem:[#allocation2 + $0x7c] ss:$12 sps:$4 sm:$0xff]   ;;  %v78_v15 = vlaneseq }
  0x21   :  { %1530 = vmatprep.subr.bf16.mxu1 %v1816_v0  ;;  %v1645_v42 = vld [vmem:[#allocation2 + $0x60] ss:$12 sps:$4 sm:$0xff]   ;;  %v1648_v44 = vld [vmem:[#allocation2 + $0x78] ss:$12 sps:$4 sm:$0xff]   ;;  %v1675_v46 = vld [vmem:[#allocation2 + $0x110] ss:$12 sps:$4 sm:$0xff]  }
  0x22   :  { %228 = vmatpush1.bf16.msra.mxu0 %v1612_v9  ;;  %v1671_v45 = vld [vmem:[#allocation2 + $0x38] ss:$12 sps:$4 sm:$0xff]   ;;  %v1653_v47 = vld [vmem:[#allocation2 + $0x94] ss:$12 sps:$4 sm:$0xff]   ;;  %v1676_v48 = vld [vmem:[#allocation2 + $0x50] ss:$12 sps:$4 sm:$0xff]  }
  0x23   :  { %229 = vmatprep.subr.bf16.mxu0 %v1613_v11  ;;  %v1680_v49 = vld [vmem:[#allocation2 + $0x128] ss:$12 sps:$4 sm:$0xff]   ;;  %v1651_v50 = vld [vmem:[#allocation2 + $0x90] ss:$12 sps:$4 sm:$0xff]   ;;  %v1656_v51 = vld [vmem:[#allocation2 + $0xac] ss:$12 sps:$4 sm:$0xff]  }
  0x24   :  { %1531 = vmatpush3.bf16.msra.mxu1 %v1628_v18  ;;  %v1681_v52 = vld [vmem:[#allocation2 + $0x68] ss:$12 sps:$4 sm:$0xff]   ;;  %v1685_v53 = vld [vmem:[#allocation2 + $0x140] ss:$12 sps:$4 sm:$0xff]   ;;  %v1659_v55 = vld [vmem:[#allocation2 + $0xc4] ss:$12 sps:$4 sm:$0xff]  }
  0x25   :  { %1532 = vmatprep.subr.bf16.mxu1 %v1816_v0  ;;  %v1654_v54 = vld [vmem:[#allocation2 + $0xa8] ss:$12 sps:$4 sm:$0xff]   ;;  %v1686_v56 = vld [vmem:[#allocation2 + $0x80] ss:$12 sps:$4 sm:$0xff]   ;;  %v1662_v59 = vld [vmem:[#allocation2 + $0xd8] ss:$12 sps:$4 sm:$0xff]  }
  0x26   :  { %230 = vmatpush1.bf16.msra.mxu0 %v1615_v13  ;;  %v1657_v57 = vld [vmem:[#allocation2 + $0xc0] ss:$12 sps:$4 sm:$0xff]   ;;  %v1664_v58 = vld [vmem:[#allocation2 + $0xdc] ss:$12 sps:$4 sm:$0xff]   ;;  %v1679_v2 = vld [vmem:[#allocation2 + $0x124] ss:$12 sps:$4 sm:$0xff]  }
  0x27   :  { %231 = vmatprep.subr.bf16.mxu0 %v1616_v14  ;;  %v1669_v60 = vld [vmem:[#allocation2 + $0xf4] ss:$12 sps:$4 sm:$0xff]   ;;  %v1667_v61 = vld [vmem:[#allocation2 + $0xf0] ss:$12 sps:$4 sm:$0xff]   ;;  %v1674_v62 = vld [vmem:[#allocation2 + $0x10c] ss:$12 sps:$4 sm:$0xff]  }
  0x28   :  { %1533 = vmatpush3.bf16.msra.mxu1 %v1629_v21  ;;  %v1672_v63 = vld [vmem:[#allocation2 + $0x108] ss:$12 sps:$4 sm:$0xff]   ;;  %v1677_v3 = vld [vmem:[#allocation2 + $0x120] ss:$12 sps:$4 sm:$0xff]   ;;  %v1682_v5 = vld [vmem:[#allocation2 + $0x138] ss:$12 sps:$4 sm:$0xff]  }
  0x29   :  { %1534 = vmatprep.subr.bf16.mxu1 %v1816_v0  ;;  %v1684_v4 = vld [vmem:[#allocation2 + $0x13c] ss:$12 sps:$4 sm:$0xff]   ;;  %v1689_v6 = vld [vmem:[#allocation2 + $0x154] ss:$12 sps:$4 sm:$0xff]   ;;  %v1690_v7 = vld [vmem:[#allocation2 + $0x158] ss:$12 sps:$4 sm:$0xff]  }
  0x2a   :  { %232 = vmatpush1.bf16.msra.mxu0 %v1618_v16  ;;  %v1687_v8 = vld [vmem:[#allocation2 + $0x150] ss:$12 sps:$4 sm:$0xff]   ;;  %v1691_v9 = vld [vmem:[#allocation2 + $0x98] ss:$12 sps:$4 sm:$0xff]   ;;  %v1692_v12 = vld [vmem:[#allocation2 + $0x168] ss:$12 sps:$4 sm:$0xff]  }
  0x2b   :  { %233 = vmatprep.subr.bf16.mxu0 %v1619_v17  ;;  %v1694_v10 = vld [vmem:[#allocation2 + $0x16c] ss:$12 sps:$4 sm:$0xff]   ;;  %v1695_v11 = vld [vmem:[#allocation2 + $0x170] ss:$12 sps:$4 sm:$0xff]   ;;  %v1963_v16 = vshrl.u32 %v78_v15, 7  ;;  %v1743_v15 = vld [vmem:[%s2109_s5 + $0x20] sm:$0xff]  }
  0x2c   :  { %1535 = vmatpush3.bf16.msra.mxu1 %v1630_v25  ;;  %v1696_v13 = vld [vmem:[#allocation2 + $0xb0] ss:$12 sps:$4 sm:$0xff]   ;;  %v76_v18 = vld [vmem:[%s2106_s2] sm:$0x7]  ;;  %vm1267_vm1 = vcmask 97328   ;;  %vm1291_vm2 = vcmask 146528  }
  0x2d   :  { %1536 = vmatprep.subr.bf16.mxu1 %v1816_v0  ;;  %v1699_v14 = vld [vmem:[#allocation2 + $0x184] ss:$12 sps:$4 sm:$0xff]   ;;  %v80_v17 = vsub.s32 0, %v1963_v16  ;;  %vm1252_vm3 = vcmask 48128   ;;  %s1820_s0 = smov 116   ;;  %s1821_s15 = smov [#allocation5]  }
  0x2e   :  { %234 = vmatpush1.bf16.msra.mxu0 %v1621_v19  ;;  %v84_v19 = vsub.s32 1, %v1963_v16  ;;  %s1320_s1 = sshll.u32 %s1821_s15, 4  ;;  %s1321_s1 = int_to_ptr.vmem [resolvable:$true] %s1320_s1 }
  0x2f   :  { %235 = vmatprep.subr.bf16.mxu0 %v1622_v20  ;;  %v81_v20 = vrot.slane %v76_v18, %v80_v17  ;;  %s1787_s16 = scalar_lea.vmem %s1321_s1, 384  ;;  %p1792_p9 = scmp.lt.s32.totalorder %s1321_s1, %s1321_s1 }
  0x30   :  { %1537 = vmatpush3.bf16.msra.mxu1 %v1631_v29  ;;  %v85_v21 = vrot.slane %v76_v18, %v84_v19  ;;  %p1788_p8 = scmp.ne.s32.totalorder %s1321_s1, %s1787_s16  ;;  %p1793_p10 = scmp.lt.s32.totalorder %s1787_s16, %s1787_s16 }
  0x31   :  { %1538 = vmatprep.subr.bf16.mxu1 %v1816_v0 }
  0x32   :  { %236 = vmatpush1.bf16.msra.mxu0 %v1624_v22  ;;  %p1794_p11 = por %p1793_p10, %p1792_p9 }
  0x33   :  { %805 = vmatprep.subr.bf16.mxu0 %v1635_v24 }
  0x34   :  { %1539 = vmatpush3.bf16.msra.mxu1 %v1632_v32  ;;  %v1700_v32 = vld [vmem:[#allocation2 + $0x188] ss:$12 sps:$4 sm:$0xff]   ;;  %p1795_p12 = pnand %p1794_p11, %p1788_p8 }
  0x35   :  { %254 = vmatmul.mubr.bf16.vlgmr.msra.gmra.mrb[0].mxu0 %v43_v26  ;;  %1462 = vmatprep.subr.bf16.mxu1 %v1660_v33 }
  0x36   :  { %806 = vmatpush1.bf16.msra.mxu0 %v1633_v27 }
  0x37   :  { %807 = vmatprep.subr.bf16.mxu0 %v1638_v28  ;;  %1541 = vmatmul.mubr.bf16.vlgmr.msra.gmra.mrb[0].mxu1 %v43_v26 }
  0x38   :  { %1463 = vmatpush3.bf16.msra.mxu1 %v1661_v36  ;;  %v1704_v36 = vld [vmem:[#allocation2 + $0x1a0] ss:$12 sps:$4 sm:$0xff]  }
  0x39   :  { %1464 = vmatprep.subr.bf16.mxu1 %v1665_v37 }
  0x3a   :  { %808 = vmatpush1.bf16.msra.mxu0 %v1636_v30 }
  0x3b   :  { %809 = vmatprep.subr.bf16.mxu0 %v1641_v31  ;;  %v1697_v31 = vld [vmem:[#allocation2 + $0x180] ss:$12 sps:$4 sm:$0xff]  }
  0x3c   :  { %1465 = vmatpush3.bf16.msra.mxu1 %v1666_v40 }
  0x3d   :  { %1466 = vmatprep.subr.bf16.mxu1 %v1670_v41 }
  0x3e   :  { %810 = vmatpush1.bf16.msra.mxu0 %v1639_v34  ;;  %v1703_v34 = vld [vmem:[#allocation2 + $0x19c] ss:$12 sps:$4 sm:$0xff]  }
  0x3f   :  { %811 = vmatprep.subr.bf16.mxu0 %v1644_v35  ;;  %v1701_v35 = vld [vmem:[#allocation2 + $0x198] ss:$12 sps:$4 sm:$0xff]  }
  0x40   :  { %1467 = vmatpush3.bf16.msra.mxu1 %v1671_v45  ;;  %v1709_v45 = vld [vmem:[#allocation2 + $0x1c8] ss:$12 sps:$4 sm:$0xff]  }
  0x41   :  { %1468 = vmatprep.subr.bf16.mxu1 %v1675_v46  ;;  %v1712_v46 = vld [vmem:[#allocation2 + $0x1d0] ss:$12 sps:$4 sm:$0xff]  }
  0x42   :  { %812 = vmatpush1.bf16.msra.mxu0 %v1642_v38  ;;  %v1707_v38 = vld [vmem:[#allocation2 + $0x1b4] ss:$12 sps:$4 sm:$0xff]  }
  0x43   :  { %813 = vmatprep.subr.bf16.mxu0 %v1647_v39 }
  0x44   :  { %1469 = vmatpush3.bf16.msra.mxu1 %v1676_v48  ;;  %v1713_v48 = vld [vmem:[#allocation2 + $0x1e0] ss:$12 sps:$4 sm:$0xff]  }
  0x45   :  { %1470 = vmatprep.subr.bf16.mxu1 %v1680_v49  ;;  %v1716_v49 = vld [vmem:[#allocation2 + $0x1e8] ss:$12 sps:$4 sm:$0xff]  }
  0x46   :  { %814 = vmatpush1.bf16.msra.mxu0 %v1645_v42  ;;  %v1705_v42 = vld [vmem:[#allocation2 + $0x1b0] ss:$12 sps:$4 sm:$0xff]  }
  0x47   :  { %815 = vmatprep.subr.bf16.mxu0 %v1650_v43  ;;  %v1708_v43 = vld [vmem:[#allocation2 + $0x1b8] ss:$12 sps:$4 sm:$0xff]  }
  0x48   :  { %1471 = vmatpush3.bf16.msra.mxu1 %v1681_v52  ;;  %v1717_v52 = vld [vmem:[#allocation2 + $0x1f8] ss:$12 sps:$4 sm:$0xff]  }
  0x49   :  { %1472 = vmatprep.subr.bf16.mxu1 %v1685_v53  ;;  %v1720_v53 = vld [vmem:[#allocation2 + $0x200] ss:$12 sps:$4 sm:$0xff]  }
  0x4a   :  { %816 = vmatpush1.bf16.msra.mxu0 %v1648_v44  ;;  %v1711_v44 = vld [vmem:[#allocation2 + $0x1cc] ss:$12 sps:$4 sm:$0xff]  }
  0x4b   :  { %817 = vmatprep.subr.bf16.mxu0 %v1653_v47  ;;  %v88_v47 = vsub.s32 2, %v1963_v16 }
  0x4c   :  { %1473 = vmatpush3.bf16.msra.mxu1 %v1686_v56  ;;  %v1721_v56 = vld [vmem:[#allocation2 + $0x210] ss:$12 sps:$4 sm:$0xff]  }
  0x4d   :  { %1474 = vmatprep.subr.bf16.mxu1 %v1690_v7  ;;  %v1736_v7 = vld [vmem:[%s2109_s5 + $0x50] sm:$0xff]  }
  0x4e   :  { %818 = vmatpush1.bf16.msra.mxu0 %v1651_v50  ;;  %v1719_v50 = vld [vmem:[#allocation2 + $0x1fc] ss:$12 sps:$4 sm:$0xff]  }
  0x4f   :  { %819 = vmatprep.subr.bf16.mxu0 %v1656_v51  ;;  %v89_v51 = vrot.slane %v76_v18, %v88_v47  ;;  %v1745_v18 = vld [vmem:[%s2109_s5 + $0x68] sm:$0xff]  }
  0x50   :  { %1475 = vmatpush3.bf16.msra.mxu1 %v1691_v9  ;;  %v1737_v9 = vld [vmem:[%s2109_s5 + $0x10] sm:$0xff]  }
  0x51   :  { %1476 = vmatprep.subr.bf16.mxu1 %v1695_v11  ;;  %v1738_v11 = vld [vmem:[%s2109_s5 + $0x98] sm:$0xff]  }
  0x52   :  { %820 = vmatpush1.bf16.msra.mxu0 %v1654_v54  ;;  %v1723_v54 = vld [vmem:[#allocation2 + $0x214] ss:$12 sps:$4 sm:$0xff]  }
  0x53   :  { %821 = vmatprep.subr.bf16.mxu0 %v1659_v55 }
  0x54   :  { %1477 = vmatpush3.bf16.msra.mxu1 %v1696_v13  ;;  %v1742_v13 = vld [vmem:[%s2109_s5 + $0x60] sm:$0xff]  }
  0x55   :  { %1544 = vmatprep.subr.bf16.mxu1 %v1816_v0 }
  0x56   :  { %822 = vmatpush1.bf16.msra.mxu0 %v1657_v57  ;;  %v1724_v57 = vld [vmem:[#allocation2 + $0x218] ss:$12 sps:$4 sm:$0xff]  }
  0x57   :  { %823 = vmatprep.subr.bf16.mxu0 %v1664_v58  ;;  %v1727_v58 = vld [vmem:[#allocation2 + $0x22c] ss:$12 sps:$4 sm:$0xff]  }
  0x5a   :  { %824 = vmatpush1.bf16.msra.mxu0 %v1662_v59 }
  0x5b   :  { %825 = vmatprep.subr.bf16.mxu0 %v1669_v60  ;;  %v1725_v60 = vld [vmem:[#allocation2 + $0x228] ss:$12 sps:$4 sm:$0xff]  }
  0x5e   :  { %826 = vmatpush1.bf16.msra.mxu0 %v1667_v61  ;;  %v1728_v61 = vld [vmem:[#allocation2 + $0x230] ss:$12 sps:$4 sm:$0xff]  }
  0x5f   :  { %827 = vmatprep.subr.bf16.mxu0 %v1674_v62 }
  0x62   :  { %828 = vmatpush1.bf16.msra.mxu0 %v1672_v63  ;;  %v1729_v63 = vld [vmem:[%s2109_s5 + $0x80] sm:$0xff]  }
  0x63   :  { %829 = vmatprep.subr.bf16.mxu0 %v1679_v2  ;;  %v1730_v2 = vld [vmem:[%s2109_s5 + $0x40] sm:$0xff]  }
  0x66   :  { %830 = vmatpush1.bf16.msra.mxu0 %v1677_v3  ;;  %v1731_v3 = vld [vmem:[%s2109_s5] sm:$0xff]  }
  0x67   :  { %831 = vmatprep.subr.bf16.mxu0 %v1684_v4  ;;  %v1733_v4 = vld [vmem:[%s2109_s5 + $0x48] sm:$0xff]  }
  0x6a   :  { %832 = vmatpush1.bf16.msra.mxu0 %v1682_v5  ;;  %v1732_v5 = vld [vmem:[%s2109_s5 + $0x88] sm:$0xff]  }
  0x6b   :  { %833 = vmatprep.subr.bf16.mxu0 %v1689_v6  ;;  %v1734_v6 = vld [vmem:[%s2109_s5 + $0x8] sm:$0xff]  }
  0x6e   :  { %834 = vmatpush1.bf16.msra.mxu0 %v1687_v8  ;;  %v1735_v8 = vld [vmem:[%s2109_s5 + $0x90] sm:$0xff]  }
  0x6f   :  { %835 = vmatprep.subr.bf16.mxu0 %v1694_v10  ;;  %v1739_v10 = vld [vmem:[%s2109_s5 + $0x58] sm:$0xff]  }
  0x72   :  { %836 = vmatpush1.bf16.msra.mxu0 %v1692_v12  ;;  %v1740_v12 = vld [vmem:[%s2109_s5 + $0x18] sm:$0xff]  }
  0x73   :  { %846 = vmatprep.subr.bf16.mxu0 %v1699_v14  ;;  %v1741_v14 = vld [vmem:[%s2109_s5 + $0xa0] sm:$0xff]  }
 0x108   :  { %v255_v22 = vpop.f32.mrb[0].mxu0 }
 0x109   :  { %v256_v23 = vadd.f32 %v255_v22, %v81_v20  ;;  %v257_v24 = vpop.f32.mrb[1].mxu0  ;;  %v1744_v20 = vld [vmem:[%s2109_s5 + $0xa8] sm:$0xff]   ;;  %v1747_v22 = vld [vmem:[%s2109_s5 + $0xb0] sm:$0xff]  }
 0x10a   :  { %v258_v25 = vadd.f32 %v257_v24, %v85_v21  ;;  %v259_v26 = vpop.f32.mrb[2].mxu0  ;;  %v296_v37 = vpop.f32.mrb[0].mxu1  ;;  %v1746_v21 = vld [vmem:[%s2109_s5 + $0x28] sm:$0xff]   ;;  %v1749_v24 = vld [vmem:[%s2109_s5 + $0x30] sm:$0xff]  }
 0x10b   :  { %v302_v27 = vmax.f32 %v256_v23, 0.0  ;;  %v260_v28 = vpop.f32.mrb[3].mxu0  ;;  %v1542_v39 = vpop.f32.mrb[1].mxu1  ;;  %v297_v55 = vadd.f32 %v296_v37, %v89_v51  ;;  %v1748_v23 = vld [vmem:[%s2109_s5 + $0x70] sm:$0xff]   ;;  %v1751_v26 = vld [vmem:[%s2109_s5 + $0x78] sm:$0xff]  }
 0x10c   :  { %v303_v29 = vmax.f32 %v258_v25, 0.0  ;;  %v299_v40 = vpop.f32.mrb[2].mxu1  ;;  %v1750_v25 = vld [vmem:[%s2109_s5 + $0xb8] sm:$0xff]  }
 0x10d   :  { %v305_v33 = vpack.c.bf16 %v302_v27, %v302_v27  ;;  %v1543_v41 = vpop.f32.mrb[3].mxu1  ;;  %v304_v59 = vmax.f32 %v297_v55, 0.0  ;;  %v1752_v27 = vld [vmem:[%s2109_s5 + $0x38] sm:$0xff]  }
 0x10e   :  { %v306_v30 = vpack.c.bf16 %v303_v29, %v303_v29 }
 0x10f   :  { %v307_v62 = vpack.c.bf16 %v304_v59, %v304_v59 }
 0x110   :  { %837 = vmatprep.mubr.bf16.mxu0 %v306_v30  ;;  %919 = vmatprep.mubr.bf16.mxu1 %v306_v30 }
 0x111   :  { %838 = vmatmul.mubr.bf16.vlgmr.msra.gmra.mrb[4].mxu0 %v305_v33  ;;  %920 = vmatmul.mubr.bf16.vlgmr.msra.gmra.mrb[4].mxu1 %v305_v33 }
 0x112   :  { %847 = vmatpush1.bf16.msra.mxu0 %v1697_v31  ;;  %1545 = vmatpush3.bf16.msra.mxu1 %v1700_v32  ;;  %v404_v32 = vld [vmem:[%s2108_s4] sm:$0x7] }
 0x113   :  { %848 = vmatprep.subr.bf16.mxu0 %v1703_v34  ;;  %1546 = vmatprep.subr.bf16.mxu1 %v1816_v0  ;;  %v417_v33 = vrot.slane %v404_v32, %v88_v47  ;;  %v409_v34 = vrot.slane %v404_v32, %v80_v17 }
 0x114   :  { %878 = vmatprep.mubr.bf16.mxu0 %v1817_v1  ;;  %1560 = vmatprep.mubr.msk.bf16.mxu1 %vm1818_vm0, %v1816_v0  ;;  %v1715_v1 = vld [vmem:[#allocation2 + $0x1e4] ss:$12 sps:$4 sm:$0xff]  }
 0x116   :  { %849 = vmatpush1.bf16.msra.mxu0 %v1701_v35  ;;  %1547 = vmatpush3.bf16.msra.mxu1 %v1704_v36  ;;  %v413_v35 = vrot.slane %v404_v32, %v84_v19 }
 0x117   :  { %850 = vmatprep.subr.bf16.mxu0 %v1707_v38  ;;  %1548 = vmatprep.subr.bf16.mxu1 %v1816_v0 }
 0x11a   :  { %851 = vmatpush1.bf16.msra.mxu0 %v1705_v42  ;;  %1549 = vmatpush3.bf16.msra.mxu1 %v1708_v43 }
 0x11b   :  { %852 = vmatprep.subr.bf16.mxu0 %v1711_v44  ;;  %1550 = vmatprep.subr.bf16.mxu1 %v1816_v0 }
 0x11e   :  { %853 = vmatpush1.bf16.msra.mxu0 %v1709_v45  ;;  %1551 = vmatpush3.bf16.msra.mxu1 %v1712_v46 }
 0x11f   :  { %854 = vmatprep.subr.bf16.mxu0 %v1715_v1  ;;  %1552 = vmatprep.subr.bf16.mxu1 %v1816_v0 }
 0x122   :  { %855 = vmatpush1.bf16.msra.mxu0 %v1713_v48  ;;  %1553 = vmatpush3.bf16.msra.mxu1 %v1716_v49 }
 0x123   :  { %856 = vmatprep.subr.bf16.mxu0 %v1719_v50  ;;  %1554 = vmatprep.subr.bf16.mxu1 %v1816_v0 }
 0x126   :  { %857 = vmatpush1.bf16.msra.mxu0 %v1717_v52  ;;  %1555 = vmatpush3.bf16.msra.mxu1 %v1720_v53 }
 0x127   :  { %858 = vmatprep.subr.bf16.mxu0 %v1723_v54  ;;  %1556 = vmatprep.subr.bf16.mxu1 %v1816_v0  ;;  %v1428_v54 = vld [vmem:[%s2110_s6] ss:$0 sm:$0xff]  ;;  %s1819_s6 = smov 122  }
 0x12a   :  { %859 = vmatpush1.bf16.msra.mxu0 %v1721_v56  ;;  %1557 = vmatpush3.bf16.msra.mxu1 %v1724_v57 }
 0x12b   :  { %860 = vmatprep.subr.bf16.mxu0 %v1727_v58  ;;  %1558 = vmatprep.subr.bf16.mxu1 %v1816_v0 }
 0x12e   :  { %861 = vmatpush1.bf16.msra.mxu0 %v1725_v60  ;;  %1559 = vmatpush3.bf16.msra.mxu1 %v1728_v61 }
 0x12f   :  { %1564 = vmatprep.subr.bf16.mxu0 %v1816_v0  ;;  %1493 = vmatprep.subr.bf16.mxu1 %v1730_v2 }
 0x131   :  { %879 = vmatmul.mubr.bf16.vlgmr.msra.gmra.mrb[4].mxu0 %v307_v62  ;;  %1561 = vmatmul.mubr.bf16.vlgmr.msra.gmra.mrb[8].mxu1 %v307_v62 }
 0x132   :  { %1580 = vmatprep.mubr.msk.bf16.mxu0 %vm1818_vm0, %v1816_v0  ;;  %1565 = vmatpush3.bf16.msra.mxu0 %v1729_v63 }
 0x133   :  { %1494 = vmatpush3.bf16.msra.mxu1 %v1731_v3  ;;  %1566 = vmatprep.subr.bf16.mxu0 %v1816_v0 }
 0x134   :  { %1495 = vmatprep.subr.bf16.mxu1 %v1733_v4 }
 0x136   :  { %1567 = vmatpush3.bf16.msra.mxu0 %v1732_v5 }
 0x137   :  { %1496 = vmatpush3.bf16.msra.mxu1 %v1734_v6  ;;  %1568 = vmatprep.subr.bf16.mxu0 %v1816_v0 }
 0x138   :  { %1497 = vmatprep.subr.bf16.mxu1 %v1736_v7 }
 0x13a   :  { %1569 = vmatpush3.bf16.msra.mxu0 %v1735_v8 }
 0x13b   :  { %1498 = vmatpush3.bf16.msra.mxu1 %v1737_v9  ;;  %1570 = vmatprep.subr.bf16.mxu0 %v1816_v0 }
 0x13c   :  { %1499 = vmatprep.subr.bf16.mxu1 %v1739_v10 }
 0x13e   :  { %1571 = vmatpush3.bf16.msra.mxu0 %v1738_v11 }
 0x13f   :  { %1500 = vmatpush3.bf16.msra.mxu1 %v1740_v12  ;;  %1572 = vmatprep.subr.bf16.mxu0 %v1816_v0 }
 0x140   :  { %1501 = vmatprep.subr.bf16.mxu1 %v1742_v13 }
 0x142   :  { %1573 = vmatpush3.bf16.msra.mxu0 %v1741_v14 }
 0x143   :  { %1502 = vmatpush3.bf16.msra.mxu1 %v1743_v15  ;;  %1574 = vmatprep.subr.bf16.mxu0 %v1816_v0 }
 0x144   :  { %1503 = vmatprep.subr.bf16.mxu1 %v1745_v18 }
 0x146   :  { %1575 = vmatpush3.bf16.msra.mxu0 %v1744_v20 }
 0x147   :  { %1504 = vmatpush3.bf16.msra.mxu1 %v1746_v21  ;;  %1576 = vmatprep.subr.bf16.mxu0 %v1816_v0 }
 0x148   :  { %1505 = vmatprep.subr.bf16.mxu1 %v1748_v23 }
 0x14a   :  { %1577 = vmatpush3.bf16.msra.mxu0 %v1747_v22 }
 0x14b   :  { %1578 = vmatprep.subr.bf16.mxu0 %v1816_v0  ;;  %1506 = vmatpush3.bf16.msra.mxu1 %v1749_v24 }
 0x14c   :  { %1507 = vmatprep.subr.bf16.mxu1 %v1751_v26 }
 0x14e   :  { %1579 = vmatpush3.bf16.msra.mxu0 %v1750_v25 }
 0x14f   :  { %1508 = vmatpush3.bf16.msra.mxu1 %v1752_v27 }
 0x1e4   :  { %v1478_v28 = vpop.f32.mrb[4].mxu1 }
 0x1e5   :  { %v1479_v29 = vpop.f32.mrb[5].mxu1 }
 0x1e6   :  { %v1480_v30 = vadd.f32 %v1479_v29, %v1478_v28  ;;  %v1481_v0 = vpop.f32.mrb[6].mxu1 }
 0x1e7   :  { %v1482_v31 = vpop.f32.mrb[7].mxu1 }
 0x1e8   :  { %v922_v36 = vadd.f32 %v1480_v30, %v417_v33 }
 0x204   :  { %v880_v37 = vpop.f32.mrb[4].mxu0  ;;  %v961_v38 = vpop.f32.mrb[8].mxu1 }
 0x205   :  { %v1584_v39 = vadd.f32 %v880_v37, %v409_v34  ;;  %v962_v40 = vadd.f32 %v961_v38, %v922_v36  ;;  %v882_v41 = vpop.f32.mrb[5].mxu0  ;;  %v1562_v42 = vpop.f32.mrb[9].mxu1 }
 0x206   :  { %v1585_v43 = vadd.f32 %v882_v41, %v413_v35  ;;  %v884_v44 = vpop.f32.mrb[6].mxu0  ;;  %v964_v45 = vpop.f32.mrb[10].mxu1 }
 0x207   :  { %v967_v46 = vmax.f32 %v1584_v39, 0.0  ;;  %v969_v1 = vmax.f32 %v962_v40, 0.0  ;;  %v885_v48 = vpop.f32.mrb[7].mxu0  ;;  %v1563_v47 = vpop.f32.mrb[11].mxu1 }
 0x208   :  { %v968_v49 = vmax.f32 %v1585_v43, 0.0 }
 0x209   :  { %v972_v50 = vpack.c.bf16 %v969_v1, %v969_v1  ;;  %v970_v51 = vpack.c.bf16 %v967_v46, %v967_v46 }
 0x20a   :  { %v971_v17 = vpack.c.bf16 %v968_v49, %v968_v49 }
 0x20b   :  { %1581 = vmatmul.mubr.bf16.vlgmr.msra.gmra.mrb[8].mxu0 %v972_v50 }
 0x20c   :  { %1204 = vmatprep.mubr.bf16.mxu1 %v971_v17 }
 0x20d   :  { %1205 = vmatmul.mubr.bf16.vlgmr.msra.gmra.mrb[12].mxu1 %v970_v51 }
 0x2de   :  { %v1246_v16 = vpop.f32.mrb[8].mxu0 }
 0x2df   :  { %v1582_v19 = vpop.f32.mrb[9].mxu0 }
 0x2e0   :  { %v1509_v52 = vpop.f32.mrb[12].mxu1  ;;  %v1249_v53 = vpop.f32.mrb[10].mxu0 }
 0x2e1   :  { %v1510_v55 = vpop.f32.mrb[13].mxu1  ;;  %v1583_v56 = vpop.f32.mrb[11].mxu0 }
 0x2e2   :  { %v1511_v57 = vadd.f32 %v1510_v55, %v1509_v52  ;;  %v1512_v58 = vpop.f32.mrb[14].mxu1 }
 0x2e3   :  { %v1513_v59 = vpop.f32.mrb[15].mxu1 }
 0x2e4   :  { %v1207_v60 = vadd.f32 %v1511_v57, %v1428_v54 }
 0x2e6   :  { %v1247_v61 = vadd.f32 %v1246_v16, %v1207_v60 }
 0x2e8   :  { %v1268_v62 = vsel %vm1267_vm1, %v1247_v61, -inf  ;;  %v1292_v63 = vsel %vm1291_vm2, %v1247_v61, -inf  ;;  %v1253_v2 = vsel %vm1252_vm3, %v1247_v61, -inf }
 0x2e9   :  { %1269 = vmax.xlane.f32.xlu0 %v1268_v62 }
 0x2ed   :  { %1293 = vmax.xlane.f32.xlu0 %v1292_v63 }
 0x2f1   :  { %1254 = vmax.xlane.f32.xlu0 %v1253_v2 }
 0x376   :  { %v1270_v3 = vpop.xlane.xlu0 %1269 }
 0x377   :  { %v1271_v4 = vsub.f32 %v1247_v61, %v1270_v3 }
 0x379   :  { %v1272_v5 = vmul.f32 1.442695, %v1271_v4 }
 0x37a   :  { %v1294_v6 = vpop.xlane.xlu0 %1293 }
 0x37b   :  { %1753 = vpow2.f32 %v1272_v5  ;;  %v1295_v7 = vsub.f32 %v1247_v61, %v1294_v6 }
 0x37d   :  { %v1296_v8 = vmul.f32 1.442695, %v1295_v7 }
 0x37e   :  { %v1255_v11 = vpop.xlane.xlu0 %1254 }
 0x37f   :  { %1755 = vpow2.f32 %v1296_v8  ;;  %v1256_v12 = vsub.f32 %v1247_v61, %v1255_v11 }
 0x381   :  { %v1257_v13 = vmul.f32 1.442695, %v1256_v12 }
 0x383   :  { %1757 = vpow2.f32 %v1257_v13 }
 0x385   :  { %v1754_v9 = vpop.eup %1753 }
 0x386   :  { %1275 = vrot.lane.b32.xlu1 %v1754_v9, %s1819_s6 }
 0x389   :  { %v1756_v10 = vpop.eup %1755 }
 0x38a   :  { %1299 = vrot.lane.b32.xlu1 %v1756_v10, %s1820_s0 }
 0x38d   :  { %v1758_v21 = vpop.eup %1757 }
 0x38e   :  { %v1259_v22 = vsel %vm1252_vm3, %v1758_v21, 0.0 }
 0x3f8   :  { %v1276_v14 = vpop.permute.xlu1 %1275 }
 0x3f9   :  { %v1278_v15 = vsel %vm1252_vm3, %v1276_v14, 0.0 }
 0x3fa   :  { %1279 = vadd.xlane.f32.xlu1 %v1278_v15 }
 0x3fc   :  { %v1300_v18 = vpop.permute.xlu1 %1299 }
 0x3fd   :  { %v1302_v20 = vsel %vm1252_vm3, %v1300_v18, 0.0 }
 0x3fe   :  { %1303 = vadd.xlane.f32.xlu0 %v1302_v20 }
 0x402   :  { %1260 = vadd.xlane.f32.xlu0 %v1259_v22 }
 0x487   :  { %v1280_v23 = vpop.xlane.xlu1 %1279 }
 0x488   :  { %1759 = vlog2.f32 %v1280_v23 }
 0x48b   :  { %v1304_v24 = vpop.xlane.xlu0 %1303 }
 0x48c   :  { %1761 = vlog2.f32 %v1304_v24 }
 0x48f   :  { %v1261_v25 = vpop.xlane.xlu0 %1260 }
 0x490   :  { %1763 = vlog2.f32 %v1261_v25 }
 0x492   :  { %v1760_v26 = vpop.eup %1759 }
 0x493   :  { %v1282_v27 = vmul.f32 0.6931472, %v1760_v26 }
 0x495   :  { %v1283_v28 = vadd.f32 %v1282_v27, %v1270_v3 }
 0x496   :  { %v1762_v29 = vpop.eup %1761 }
 0x497   :  { %v1306_v30 = vmul.f32 0.6931472, %v1762_v29  ;;  %v1284_v0 = vsub.f32 %v1247_v61, %v1283_v28 }
 0x499   :  { %v1307_v31 = vadd.f32 %v1306_v30, %v1294_v6  ;;  %1286 = vrot.lane.b32.xlu0 %v1284_v0, %s1819_s6 }
 0x49a   :  { %v1764_v32 = vpop.eup %1763 }
 0x49b   :  { %v1263_v33 = vmul.f32 0.6931472, %v1764_v32  ;;  %v1308_v34 = vsub.f32 %v1247_v61, %v1307_v31 }
 0x49d   :  { %v1264_v35 = vadd.f32 %v1263_v33, %v1255_v11  ;;  %1310 = vrot.lane.b32.xlu0 %v1308_v34, %s1820_s0 }
 0x49f   :  { %v1265_v36 = vsub.f32 %v1247_v61, %v1264_v35 }
 0x4a1   :  { %1266 = vst.msk [vmem:[#allocation5] sm:$0xff] %vm1252_vm3, %v1265_v36 }
 0x50b   :  { %v1287_v37 = vpop.permute.xlu0 %1286 }
 0x50c   :  { %1290 = vst.msk [vmem:[#allocation5 + $0x8] sm:$0xff] %vm1252_vm3, %v1287_v37 }
 0x50f   :  { %v1311_v38 = vpop.permute.xlu0 %1310 }
 0x510   :  { %1314 = vst.msk [vmem:[#allocation5 + $0x10] sm:$0xff] %vm1252_vm3, %v1311_v38 }
 0x511   :  { %1798 = shalt.err (!%p1795_p12)
}
 0x512   :  { %s1799_s18 = scalar_lea.hbm %s2111_s7, 384 }
 0x513   :  { %p1800_p13 = scmp.ne.s32.totalorder %s2111_s7, %s1799_s18  ;;  %p1803_p0 = scmp.lt.u32.totalorder %s1799_s18, %s2111_s7 }
 0x515   :  { %p1805_p1 = pnand %p1803_p0, %p1800_p13 }
 0x517   :  { %1808 = shalt.err (!%p1805_p1)
}
 0x518   :  { %s1822_s22 = smov 128   ;;  %s1823_s23 = smov 8  }
 0x519   :  { %1326 = dma.vmem_to_hbm [thread:$0]  %s1321_s1, 384, %s2111_s7, [#allocation4], %s1822_s22, %s1822_s22, %s1823_s23  }
 0x51a   :  { %1811 = dma.done.wait [#allocation4], 384  }
 0x51b   :  { %1812 = vsyncadd [#allocation4], 4294966912 }
 0x51c   :  { %1330 = vsyncpa [#allocation3], 1 }
 0x51d   :  { %1331 = vsyncpa [#allocation4], 1 }

</bundles_post_ra>
